<compile_context>
chip_gen: v7x
topology: tpu7x:2x2x1
jax: 0.10.0
libtpu: 0.0.40
codegen_flags: <defaults>
</compile_context>

<pallas_src>
import jax
import jax.numpy as jnp
from jax.experimental import pallas as pl
from jax.experimental.pallas import tpu as pltpu


# ---------------------------------------------------------------------------
# Kernel 1: im2col matmul (7x7 s2 conv) + fused BN(eval) + ReLU + final 1x1 conv
# ---------------------------------------------------------------------------
def _conv_bn_relu_cls_kernel(p_ref, w_ref, scale_ref, shift_ref, wf_ref, bf_ref,
                             o_ref):
    # 7x7 conv as im2col matmul: bf16 operands, f32 accumulate on the MXU.
    acc = jnp.dot(p_ref[...], w_ref[...], preferred_element_type=jnp.float32)
    # Fused conv-bias + BatchNorm(eval) + ReLU, kept in f32 on the VPU.
    feat = jnp.maximum(acc * scale_ref[...] + shift_ref[...], 0.0)
    # Final 1x1 conv (commuted ahead of the bilinear upsample -> low res).
    cls = jnp.dot(feat.astype(wf_ref.dtype), wf_ref[...],
                  preferred_element_type=jnp.float32)
    o_ref[...] = cls + bf_ref[...]


# ---------------------------------------------------------------------------
# Kernel 2: bilinear upsample of the low-res class map as two dense matmuls
#           out[b] = Ry @ low[b] @ Rx^T       (align_corners=False weights)
# ---------------------------------------------------------------------------
def _bilinear_kernel(low_ref, ry_ref, rxt_ref, o_ref):
    tmp = jnp.dot(ry_ref[...], low_ref[...], preferred_element_type=jnp.float32)
    o_ref[...] = jnp.dot(tmp, rxt_ref[...], preferred_element_type=jnp.float32)


# ---------------------------------------------------------------------------
# Helpers
# ---------------------------------------------------------------------------
_KDIM_PAD = 256  # contraction dim 7*7*3 = 147 zero-padded to 2x128 lanes


def _round_up(x, mult):
    return ((x + mult - 1) // mult) * mult


def _row_tile(m, cap=2048):
    """Pick a row tile (multiple of 16 for bf16 packing) and the padded row count."""
    tm = min(cap, _round_up(m, 16))
    return tm, _round_up(m, tm)


# ---------------------------------------------------------------------------
# block1 (conv7x7 s2 + BN + ReLU) fused with the final 1x1 conv, at low res
# ---------------------------------------------------------------------------
def conv7x7_bn_relu_1x1(x_nchw, w, b, gamma, beta, mean, var, wf, bf, eps=1e-5):
    n, cin, h, wd = x_nchw.shape
    cout = w.shape[0]
    nc = wf.shape[0]
    k, stride, pad = 7, 2, 3
    ho = (h + 2 * pad - k) // stride + 1
    wo = (wd + 2 * pad - k) // stride + 1

    # im2col (glue): ordering (kh, kw, cin) matches the weight reshape below.
    x = jnp.transpose(x_nchw, (0, 2, 3, 1))                       # NHWC
    xp = jnp.pad(x, ((0, 0), (pad, pad), (pad, pad), (0, 0)))
    patches = jnp.concatenate(
        [xp[:, kh:kh + stride * ho:stride, kw:kw + stride * wo:stride, :]
         for kh in range(k) for kw in range(k)], axis=-1)          # (N,Ho,Wo,k*k*Cin)

    m = n * ho * wo
    kdim = k * k * cin
    tm, m_pad = _row_tile(m)

    patches = patches.reshape(m, kdim)
    patches = jnp.pad(patches, ((0, m_pad - m), (0, _KDIM_PAD - kdim)))
    patches = patches.astype(jnp.bfloat16)                        # halve HBM bytes

    w2d = jnp.transpose(w, (2, 3, 1, 0)).reshape(kdim, cout)      # (kh,kw,cin) -> cout
    w2d = jnp.pad(w2d, ((0, _KDIM_PAD - kdim), (0, 0))).astype(jnp.bfloat16)

    scale = (gamma / jnp.sqrt(var + eps)).astype(jnp.float32)     # fused conv-bias + BN
    shift = (beta + (b - mean) * scale).astype(jnp.float32)

    wf2d = jnp.transpose(wf.reshape(nc, cout), (1, 0)).astype(jnp.bfloat16)  # (64, nc)
    bf2d = bf.reshape(1, nc).astype(jnp.float32)

    out = pl.pallas_call(
        _conv_bn_relu_cls_kernel,
        out_shape=jax.ShapeDtypeStruct((m_pad, nc), jnp.float32),
        grid=(m_pad // tm,),
        in_specs=[
            pl.BlockSpec((tm, _KDIM_PAD), lambda i: (i, 0)),
            pl.BlockSpec((_KDIM_PAD, cout), lambda i: (0, 0)),
            pl.BlockSpec((1, cout), lambda i: (0, 0)),
            pl.BlockSpec((1, cout), lambda i: (0, 0)),
            pl.BlockSpec((cout, nc), lambda i: (0, 0)),
            pl.BlockSpec((1, nc), lambda i: (0, 0)),
        ],
        out_specs=pl.BlockSpec((tm, nc), lambda i: (i, 0)),
        compiler_params=pltpu.CompilerParams(
            dimension_semantics=("parallel",)),
    )(patches, w2d, scale.reshape(1, cout), shift.reshape(1, cout), wf2d, bf2d)
    return out[:m].reshape(n, ho, wo, nc)                         # (N, Hlow, Wlow, nc)


# ---------------------------------------------------------------------------
# F.interpolate(bilinear, align_corners=False) on the low-res class map
# ---------------------------------------------------------------------------
def _interp_matrix(in_size, out_size):
    """Dense (out, in) interpolation matrix matching PyTorch align_corners=False."""
    scale = in_size / out_size
    i = jnp.arange(out_size, dtype=jnp.float32)
    src = jnp.maximum((i + 0.5) * scale - 0.5, 0.0)               # PyTorch clamp
    i0 = jnp.clip(jnp.floor(src).astype(jnp.int32), 0, in_size - 1)
    i1 = jnp.minimum(i0 + 1, in_size - 1)
    lam1 = src - i0.astype(jnp.float32)
    lam0 = 1.0 - lam1
    oh0 = jax.nn.one_hot(i0, in_size, dtype=jnp.float32)
    oh1 = jax.nn.one_hot(i1, in_size, dtype=jnp.float32)
    return lam0[:, None] * oh0 + lam1[:, None] * oh1              # rows sum to 1


def bilinear_upsample(low_nhwc, out_hw):
    n, hin, win, nc = low_nhwc.shape
    hout, wout = out_hw
    ry = _interp_matrix(hin, hout)                                # (Hout, Hin)
    rxt = jnp.transpose(_interp_matrix(win, wout), (1, 0))        # (Win, Wout)

    # (N, Hin, Win, nc) -> (N*nc, Hin, Win); a free reshape when nc == 1.
    low = jnp.transpose(low_nhwc, (0, 3, 1, 2)).reshape(n * nc, hin, win)

    # TODO(synk): for very large images, additionally tile the Hout axis so the
    #             (Hout, Wout) output block stays within v5e's 16 MiB scoped VMEM.
    out = pl.pallas_call(
        _bilinear_kernel,
        out_shape=jax.ShapeDtypeStruct((n * nc, hout, wout), jnp.float32),
        grid=(n * nc,),
        in_specs=[
            pl.BlockSpec((None, hin, win), lambda bidx: (bidx, 0, 0)),
            pl.BlockSpec((hout, hin), lambda bidx: (0, 0)),
            pl.BlockSpec((win, wout), lambda bidx: (0, 0)),
        ],
        out_specs=pl.BlockSpec((None, hout, wout), lambda bidx: (bidx, 0, 0)),
        compiler_params=pltpu.CompilerParams(
            dimension_semantics=("parallel",)),
    )(low, ry, rxt)
    return out.reshape(n, nc, hout, wout)                         # already NCHW


# ---------------------------------------------------------------------------
# Full FCN forward
# ---------------------------------------------------------------------------
def fcn_forward(params, x_nchw):
    input_hw = x_nchw.shape[-2:]
    # block1 + final 1x1 conv, both evaluated at low resolution (the 1x1 conv
    # commutes with the bilinear upsample; bias preserved since weights sum to 1).
    low_cls = conv7x7_bn_relu_1x1(
        x_nchw,
        params['conv1_w'], params['conv1_b'],
        params['bn1_gamma'], params['bn1_beta'],
        params['bn1_mean'], params['bn1_var'],
        params['final_w'], params['final_b'])
    # depth_reduce (ConvBlock) is an identity in the reference -> no-op.
    return bilinear_upsample(low_cls, input_hw)                   # NCHW output


def init_params(key, num_classes=1):
    ks = jax.random.split(key, 6)
    return {
        'conv1_w': 0.05 * jax.random.normal(ks[0], (64, 3, 7, 7), jnp.float32),
        'conv1_b': 0.01 * jax.random.normal(ks[1], (64,), jnp.float32),
        'bn1_gamma': 1.0 + 0.1 * jax.random.normal(ks[2], (64,), jnp.float32),
        'bn1_beta': 0.1 * jax.random.normal(ks[3], (64,), jnp.float32),
        'bn1_mean': 0.05 * jax.random.normal(ks[4], (64,), jnp.float32),
        'bn1_var': jnp.ones((64,), jnp.float32),
        'final_w': 0.05 * jax.random.normal(ks[5], (num_classes, 64, 1, 1),
                                            jnp.float32),
        'final_b': jnp.zeros((num_classes,), jnp.float32),
    }


if __name__ == "__main__":
    key = jax.random.PRNGKey(0)
    pkey, xkey = jax.random.split(key)
    params = init_params(pkey, num_classes=1)
    x = jax.random.normal(xkey, (2, 3, 16, 16), jnp.float32)      # NCHW like PyTorch
    out = jax.jit(fcn_forward)(params, x)
    jax.block_until_ready(out)
    assert out.shape == (2, 1, 16, 16), out.shape
    print("KERNEL_OK")
</pallas_src>

<mosaic_0001>
module attributes {stable_mosaic.version = 11 : i64} {
  func.func @_conv_bn_relu_cls_kernel(%arg0: i32, %arg1: memref<128x256xbf16, #tpu.memory_space<vmem>>, %arg2: memref<256x64xbf16, #tpu.memory_space<vmem>>, %arg3: memref<1x64xf32, #tpu.memory_space<vmem>>, %arg4: memref<1x64xf32, #tpu.memory_space<vmem>>, %arg5: memref<64x1xbf16, #tpu.memory_space<vmem>>, %arg6: memref<1x1xf32, #tpu.memory_space<vmem>>, %arg7: memref<128x1xf32, #tpu.memory_space<vmem>>) attributes {dimension_semantics = [#tpu.dimension_semantics<parallel>], iteration_bounds = array<i64: 1>, scalar_prefetch = 0 : i64, scratch_operands = 0 : i64, tpu.core_type = #tpu.core_type<tc>, window_params = [{transform_indices = @transform_0, window_bounds = array<i64: 128, 256>}, {pipeline_mode = #tpu.pipeline_mode<synchronous>, transform_indices = @transform_1, window_bounds = array<i64: 256, 64>}, {pipeline_mode = #tpu.pipeline_mode<synchronous>, transform_indices = @transform_2, window_bounds = array<i64: 1, 64>}, {pipeline_mode = #tpu.pipeline_mode<synchronous>, transform_indices = @transform_3, window_bounds = array<i64: 1, 64>}, {pipeline_mode = #tpu.pipeline_mode<synchronous>, transform_indices = @transform_4, window_bounds = array<i64: 64, 1>}, {pipeline_mode = #tpu.pipeline_mode<synchronous>, transform_indices = @transform_5, window_bounds = array<i64: 1, 1>}, {transform_indices = @transform_6, window_bounds = array<i64: 128, 1>}]} {
    %c0 = arith.constant 0 : index
    %c0_0 = arith.constant 0 : index
    %0 = vector.load %arg1[%c0, %c0_0] : memref<128x256xbf16, #tpu.memory_space<vmem>>, vector<128x256xbf16>
    %c0_1 = arith.constant 0 : index
    %c0_2 = arith.constant 0 : index
    %1 = vector.load %arg2[%c0_1, %c0_2] : memref<256x64xbf16, #tpu.memory_space<vmem>>, vector<256x64xbf16>
    %cst = arith.constant dense<0.000000e+00> : vector<128x64xf32>
    %2 = tpu.matmul %0, %1, %cst {dimension_numbers = #tpu.dot_dimension_numbers<[1], [0], [0], [1], [0, 0, 1, 1], [], []>} : vector<128x256xbf16>, vector<256x64xbf16>, vector<128x64xf32> -> vector<128x64xf32>
    %c0_3 = arith.constant 0 : index
    %c0_4 = arith.constant 0 : index
    %3 = vector.load %arg3[%c0_3, %c0_4] : memref<1x64xf32, #tpu.memory_space<vmem>>, vector<1x64xf32>
    %4 = vector.broadcast %3 : vector<1x64xf32> to vector<128x64xf32>
    %5 = arith.mulf %2, %4 : vector<128x64xf32>
    %c0_5 = arith.constant 0 : index
    %c0_6 = arith.constant 0 : index
    %6 = vector.load %arg4[%c0_5, %c0_6] : memref<1x64xf32, #tpu.memory_space<vmem>>, vector<1x64xf32>
    %7 = vector.broadcast %6 : vector<1x64xf32> to vector<128x64xf32>
    %8 = arith.addf %5, %7 : vector<128x64xf32>
    %cst_7 = arith.constant 0.000000e+00 : f32
    %9 = vector.broadcast %cst_7 : f32 to vector<128x64xf32>
    %10 = arith.maximumf %8, %9 : vector<128x64xf32>
    %11 = arith.truncf %10 : vector<128x64xf32> to vector<128x64xbf16>
    %c0_8 = arith.constant 0 : index
    %c0_9 = arith.constant 0 : index
    %12 = vector.load %arg5[%c0_8, %c0_9] : memref<64x1xbf16, #tpu.memory_space<vmem>>, vector<64x1xbf16>
    %cst_10 = arith.constant dense<0.000000e+00> : vector<128x1xf32>
    %13 = tpu.matmul %11, %12, %cst_10 {dimension_numbers = #tpu.dot_dimension_numbers<[1], [0], [0], [1], [0, 0, 1, 1], [], []>} : vector<128x64xbf16>, vector<64x1xbf16>, vector<128x1xf32> -> vector<128x1xf32>
    %c0_11 = arith.constant 0 : index
    %c0_12 = arith.constant 0 : index
    %14 = vector.load %arg6[%c0_11, %c0_12] : memref<1x1xf32, #tpu.memory_space<vmem>>, vector<1x1xf32>
    %15 = vector.broadcast %14 : vector<1x1xf32> to vector<128x1xf32>
    %16 = arith.addf %13, %15 : vector<128x1xf32>
    %c0_13 = arith.constant 0 : index
    %c0_14 = arith.constant 0 : index
    %17 = vector.load %arg7[%c0_13, %c0_14] : memref<128x1xf32, #tpu.memory_space<vmem>>, vector<128x1xf32>
    tpu.vector_store %arg7[%c0_13, %c0_14], %16 {strides = array<i32>} : memref<128x1xf32, #tpu.memory_space<vmem>>, vector<128x1xf32>,
    return
  }
  func.func @transform_0(%arg0: i32) -> (i32, i32) {
    %c0_i32 = arith.constant 0 : i32
    %c0_i32_0 = arith.constant 0 : i32
    return %arg0, %c0_i32 : i32, i32
  }
  func.func @transform_1(%arg0: i32) -> (i32, i32) {
    %c0_i32 = arith.constant 0 : i32
    %c0_i32_0 = arith.constant 0 : i32
    %c0_i32_1 = arith.constant 0 : i32
    return %c0_i32, %c0_i32_0 : i32, i32
  }
  func.func @transform_2(%arg0: i32) -> (i32, i32) {
    %c0_i32 = arith.constant 0 : i32
    %c0_i32_0 = arith.constant 0 : i32
    %c0_i32_1 = arith.constant 0 : i32
    return %c0_i32, %c0_i32_0 : i32, i32
  }
  func.func @transform_3(%arg0: i32) -> (i32, i32) {
    %c0_i32 = arith.constant 0 : i32
    %c0_i32_0 = arith.constant 0 : i32
    %c0_i32_1 = arith.constant 0 : i32
    return %c0_i32, %c0_i32_0 : i32, i32
  }
  func.func @transform_4(%arg0: i32) -> (i32, i32) {
    %c0_i32 = arith.constant 0 : i32
    %c0_i32_0 = arith.constant 0 : i32
    %c0_i32_1 = arith.constant 0 : i32
    return %c0_i32, %c0_i32_0 : i32, i32
  }
  func.func @transform_5(%arg0: i32) -> (i32, i32) {
    %c0_i32 = arith.constant 0 : i32
    %c0_i32_0 = arith.constant 0 : i32
    %c0_i32_1 = arith.constant 0 : i32
    return %c0_i32, %c0_i32_0 : i32, i32
  }
  func.func @transform_6(%arg0: i32) -> (i32, i32) {
    %c0_i32 = arith.constant 0 : i32
    %c0_i32_0 = arith.constant 0 : i32
    return %arg0, %c0_i32 : i32, i32
  }
}

module attributes {stable_mosaic.version = 11 : i64} {
  func.func @_bilinear_kernel(%arg0: i32, %arg1: memref<1x8x8xf32, #tpu.memory_space<vmem>>, %arg2: memref<16x8xf32, #tpu.memory_space<vmem>>, %arg3: memref<8x16xf32, #tpu.memory_space<vmem>>, %arg4: memref<1x16x16xf32, #tpu.memory_space<vmem>>) attributes {dimension_semantics = [#tpu.dimension_semantics<parallel>], iteration_bounds = array<i64: 2>, scalar_prefetch = 0 : i64, scratch_operands = 0 : i64, tpu.core_type = #tpu.core_type<tc>, window_params = [{transform_indices = @transform_0, window_bounds = array<i64: 1, 8, 8>}, {pipeline_mode = #tpu.pipeline_mode<synchronous>, transform_indices = @transform_1, window_bounds = array<i64: 16, 8>}, {pipeline_mode = #tpu.pipeline_mode<synchronous>, transform_indices = @transform_2, window_bounds = array<i64: 8, 16>}, {transform_indices = @transform_3, window_bounds = array<i64: 1, 16, 16>}]} {
    %c0 = arith.constant 0 : index
    %c0_0 = arith.constant 0 : index
    %0 = vector.load %arg2[%c0, %c0_0] : memref<16x8xf32, #tpu.memory_space<vmem>>, vector<16x8xf32>
    %c0_1 = arith.constant 0 : index
    %c0_2 = arith.constant 0 : index
    %c0_3 = arith.constant 0 : index
    %1 = vector.load %arg1[%c0_1, %c0_2, %c0_3] : memref<1x8x8xf32, #tpu.memory_space<vmem>>, vector<1x8x8xf32>
    %2 = vector.shape_cast %1 : vector<1x8x8xf32> to vector<8x8xf32>
    %cst = arith.constant dense<0.000000e+00> : vector<16x8xf32>
    %3 = tpu.matmul %0, %2, %cst {dimension_numbers = #tpu.dot_dimension_numbers<[1], [0], [0], [1], [0, 0, 1, 1], [], []>} : vector<16x8xf32>, vector<8x8xf32>, vector<16x8xf32> -> vector<16x8xf32>
    %c0_4 = arith.constant 0 : index
    %c0_5 = arith.constant 0 : index
    %4 = vector.load %arg3[%c0_4, %c0_5] : memref<8x16xf32, #tpu.memory_space<vmem>>, vector<8x16xf32>
    %cst_6 = arith.constant dense<0.000000e+00> : vector<16x16xf32>
    %5 = tpu.matmul %3, %4, %cst_6 {dimension_numbers = #tpu.dot_dimension_numbers<[1], [0], [0], [1], [0, 0, 1, 1], [], []>} : vector<16x8xf32>, vector<8x16xf32>, vector<16x16xf32> -> vector<16x16xf32>
    %c0_7 = arith.constant 0 : index
    %c0_8 = arith.constant 0 : index
    %c0_9 = arith.constant 0 : index
    %6 = vector.load %arg4[%c0_7, %c0_8, %c0_9] : memref<1x16x16xf32, #tpu.memory_space<vmem>>, vector<1x16x16xf32>
    %7 = vector.shape_cast %6 : vector<1x16x16xf32> to vector<16x16xf32>
    %8 = vector.shape_cast %5 : vector<16x16xf32> to vector<1x16x16xf32>
    tpu.vector_store %arg4[%c0_7, %c0_8, %c0_9], %8 {strides = array<i32>} : memref<1x16x16xf32, #tpu.memory_space<vmem>>, vector<1x16x16xf32>,
    return
  }
  func.func @transform_0(%arg0: i32) -> (i32, i32, i32) {
    %c0_i32 = arith.constant 0 : i32
    %c0_i32_0 = arith.constant 0 : i32
    %c0_i32_1 = arith.constant 0 : i32
    return %arg0, %c0_i32, %c0_i32_0 : i32, i32, i32
  }
  func.func @transform_1(%arg0: i32) -> (i32, i32) {
    %c0_i32 = arith.constant 0 : i32
    %c0_i32_0 = arith.constant 0 : i32
    %c0_i32_1 = arith.constant 0 : i32
    return %c0_i32, %c0_i32_0 : i32, i32
  }
  func.func @transform_2(%arg0: i32) -> (i32, i32) {
    %c0_i32 = arith.constant 0 : i32
    %c0_i32_0 = arith.constant 0 : i32
    %c0_i32_1 = arith.constant 0 : i32
    return %c0_i32, %c0_i32_0 : i32, i32
  }
  func.func @transform_3(%arg0: i32) -> (i32, i32, i32) {
    %c0_i32 = arith.constant 0 : i32
    %c0_i32_0 = arith.constant 0 : i32
    %c0_i32_1 = arith.constant 0 : i32
    return %arg0, %c0_i32, %c0_i32_0 : i32, i32, i32
  }
}

</mosaic_0001>

<bundles_post_ra>
// kernel: fcn_forward.3
= control target key start
LH: loop header
LB: loop body
LE: loop exit
PB: predicated region body
PF: predicated region fallthrough
CT: control target
= control target key end

     0   :  { %8 = vsyncpa [#allocation3], 0  ;;  %s688_s0 = inlined_call_operand.vmem [shape: f32[2,8,8], index: 0, kind: input, shape index: {}]   ;;  %s689_s1 = inlined_call_operand.vmem [shape: f32[16,8], index: 1, kind: input, shape index: {}]   ;;  %s690_s2 = inlined_call_operand.vmem [shape: f32[8,16], index: 2, kind: input, shape index: {}]   ;;  %s691_s3 = inlined_call_operand.hbm [shape: f32[2,16,16], index: 3, kind: output, shape index: {}]  }
   0x1   :  { %10 = vsyncpa [#allocation3 + $0x1], 0  ;;  %s572_s12 = smov 0   ;;  %s574_s13 = smov 0  }
   0x2   :  { %s576_s14 = smov 0   ;;  %s578_s15 = smov 0  }
   0x3 LB: > { %s593_s16 = sadd.s32 4294967295, %s547_s15   ;;  %s412_s17 = sadd.s32 4294967294, %s547_s15   ;;  %s547_s15 = sphi %s578_s15, %s697_s15   ;;  %s543_s14 = sphi %s576_s14, %s696_s14   ;;  %s539_s13 = sphi %s574_s13, %s695_s13   ;;  %s535_s12 = sphi %s572_s12, %s694_s12  }
   0x4   : > { %s597_s18 = sadd.s32 1, %s547_s15   ;;  %s91_s19 = sadd.s32 1, %s543_s14 }
   0x5   : > { %s88_s20 = ssub.s32 %s547_s15, %s597_s18  ;;  %p101_p0 = scmp.ne.s32.totalorder %s543_s14, %s539_s13 }
   0x6   : > { %p89_p1 = scmp.eq.s32.totalorder %s88_s20, 0  ;;  %p102_p2 = scmp.eq.s32.totalorder %s593_s16, 1 }
   0x7   : > { %p107_p3 = scmp.ne.s32.totalorder %s539_s13, %s535_s12  ;;  %p108_p4 = scmp.eq.s32.totalorder %s412_s17, 1 }
   0x8   : > { %s608_s21 = scalar_select %p89_p1, %s543_s14, %s91_s19  }
   0x9   : > { %p610_p5 = por %p102_p2, %p101_p0  ;;  %p614_p6 = por %p108_p4, %p107_p3 }
   0xa   : > { %p415_p7 = scmp.ge.s32.totalorder %s547_s15, 1  ;;  %p139_p8 = scmp.lt.s32.totalorder %s547_s15, 3 }
   0xc   : > { %p140_p9 = pnand %p415_p7, %p139_p8 }
   0xd   : > { %p162_p10 = scmp.lt.s32.totalorder (!%p140_p9), %s593_s16, 1  ;;  %v166_v0 = vld [vmem:[%s689_s1] sm:$0xff] (!%p140_p9)  ;;  %vm169_vm0 = vcmask (!%p140_p9), 64512   ;;  %v167_v2 = vld [vmem:[%s689_s1 + $0x8] sm:$0xff] (!%p140_p9)  ;;  %s159_s8 = sand.u32 (!%p140_p9), 1, %s539_s13   ;;  %vm333_vm1 = vcmask (!%p140_p9), 130048  }
   0xe   : > { %143 = sbr.rel (%p140_p9) target bundleno = 470 (0x1d6), region = 32  ;;  %436 = vmatprep.mubr.msk.f32.mxu0 (!%p140_p9), %vm169_vm0, %v166_v0  ;;  %v251_v3 = vld [vmem:[%s690_s2] sm:$0xff] (!%p140_p9)  ;;  %s416_s9 = sshll.u32 (!%p140_p9), %s159_s8, 4 }
   0xf   : > { %439 = vmatprep.subr.mxu1 (!%p140_p9), %v251_v3  ;;  %s161_s10 = scalar_lea.vmem (!%p140_p9), [#allocation2], %s416_s9  ;;  %s427_s17 = sshll.u32 (!%p140_p9), %s593_s16, 8 }
  0x10   : > { %440 = vmatpush3.msra.mxu1 (!%p140_p9), %v251_v3  ;;  %s350_s11 = sshll.u32 (!%p140_p9), %s161_s10, 4  ;;  %s645_s24 = scalar_lea.hbm (!%p140_p9), %s691_s3, %s427_s17  ;;  %s640_s11 = int_to_ptr.vmem [resolvable:$true] %s350_s11 }
  0x11   : > { %s647_s25 = scalar_lea.sflag (!%p140_p9), [#allocation3], %s159_s8 }
  0x15   : > { %s163_s26 = scalar_select %p162_p10, %s593_s16, 1 }
  0x16   : > { %s549_s16 = smov [#allocation2]  }
  0x17   : > { %s417_s27 = sshll.u32 %s163_s26, 3  ;;  %s485_s26 = scalar_lea.vmem %s640_s11, 256 }
  0x18   : > { %s165_s30 = scalar_lea.vmem %s688_s0, %s417_s27  ;;  %p486_p11 = scmp.ne.s32.totalorder %s640_s11, %s485_s26 }
  0x19   : > { %v168_v1 = vld [vmem:[%s165_s30] sm:$0xff]  ;;  %s489_s27 = sshll.u32 %s549_s16, 4  ;;  %s490_s27 = int_to_ptr.vmem [resolvable:$false] %s489_s27 }
  0x1a   : > { %434 = vmatprep.subr.mxu0 %v168_v1  ;;  %p487_p12 = pnand %p486_p11, %p610_p5  ;;  %s491_s28 = scalar_lea.vmem %s490_s27, 512 }
  0x1b   : > { %435 = vmatpush3.msra.mxu0 %v168_v1  ;;  %p492_p0 = scmp.lt.s32.totalorder %s640_s11, %s490_s27  ;;  %p493_p1 = scmp.lt.s32.totalorder %s491_s28, %s485_s26 }
  0x1c   : > { %437 = vmatmul.mubr.msk.f32.vlgmr.msra.gmra.mrb[0].mxu0 %vm169_vm0, %v167_v2  ;;  %p488_p13 = pneg %p487_p12 }
  0x1d   : > { %p494_p2 = por %p493_p1, %p492_p0 }
  0x1f   : > { %p495_p3 = pnand %p494_p2, %p488_p13 }
  0xef   : > { %v438_v4 = vpop.f32.mrb[0].mxu0 }
  0xf0   : > { %v242_v5 = vpop.f32.mrb[1].mxu0 }
  0xf1   : > { %441 = vmatprep.mubr.msk.f32.mxu1 %vm169_vm0, %v242_v5 }
  0xf2   : > { %442 = vmatmul.mubr.msk.f32.vlgmr.msra.gmra.mrb[0].mxu1 %vm169_vm0, %v438_v4 }
 0x1c5   : > { %v443_v6 = vpop.f32.mrb[0].mxu1 }
 0x1c6   : > { %335 = vst.msk [vmem:[%s161_s10 + $0x8] sm:$0xff] %vm333_vm1, %v443_v6  ;;  %v324_v7 = vpop.f32.mrb[1].mxu1 }
 0x1c7   : > { %334 = vst.msk [vmem:[%s161_s10] sm:$0xff] %vm333_vm1, %v324_v7 }
 0x1c8   : > { %498 = shalt.err (!%p495_p3)
}
 0x1c9   : > { %s499_s29 = scalar_lea.hbm %s645_s24, 256  ;;  %s503_s5 = scalar_lea.hbm %s691_s3, 512 }
 0x1ca   : > { %p500_p4 = scmp.ne.s32.totalorder %s645_s24, %s499_s29  ;;  %p504_p9 = scmp.lt.u32.totalorder %s645_s24, %s691_s3 }
 0x1cb   : > { %p505_p10 = scmp.lt.u32.totalorder %s503_s5, %s499_s29  ;;  %p507_p12 = scmp.lt.u32.totalorder %s499_s29, %s645_s24 }
 0x1cc   : > { %p501_p7 = pnand %p500_p4, %p610_p5 }
 0x1cd   : > { %p506_p11 = por %p505_p10, %p504_p9 }
 0x1ce   : > { %p502_p8 = pneg %p501_p7 }
 0x1cf   : > { %p508_p13 = por %p507_p12, %p506_p11 }
 0x1d1   : > { %p509_p0 = pnand %p508_p13, %p502_p8 }
 0x1d3   : > { %512 = shalt.err (!%p509_p0)
}
 0x1d4   : > { %s550_s8 = smov 128   ;;  %s551_s9 = smov 8  }
 0x1d5   : > { %444 = dma.vmem_to_hbm [thread:$0]  (%p610_p5), %s640_s11, 256, %s645_s24, %s647_s25, %s550_s8, %s550_s8, %s551_s9  }
 0x1d6 PF: > { %p450_p1 = scmp.ge.s32.totalorder %s547_s15, 2  ;;  %s365_s10 = sand.u32 1, %s535_s12  }
 0x1d7   : > { %s366_s17 = scalar_lea.sflag [#allocation3], %s365_s10 }
 0x1d8   : > { %p447_p2 = pnand %p450_p1, %p614_p6 }
 0x1da   : > { %530 = dma.done.wait (!%p447_p2), %s366_s17, 256  }
 0x1db   : > { %532 = vsyncadd (!%p447_p2), %s366_s17, 4294967040  ;;  %p13_p3 = scmp.ge.s32.totalorder %s597_s18, 4   ;;  %s694_s12 = smov %s539_s13 }
 0x1dc   : > { %s695_s13 = smov %s543_s14  ;;  %s696_s14 = smov %s608_s21 }
 0x1dd   : > { %s697_s15 = smov %s597_s18  ;;  %15 = sbr.rel (!%p13_p3) target bundleno = 3 (0x3), region = 67 }
 0x1e4   :  { %371 = vsyncpa [#allocation3], 1 }
 0x1e5   :  { %373 = vsyncpa [#allocation3 + $0x1], 1 }

// kernel: fcn_forward.2
= control target key start
LH: loop header
LB: loop body
LE: loop exit
PB: predicated region body
PF: predicated region fallthrough
CT: control target
= control target key end

     0   :  { %vm456_vm0 = vcmask 523264   ;;  %vm578_vm1 = vcmask 7168   ;;  %s1069_s1 = inlined_call_operand.vmem [shape: bf16[256,64], index: 1, kind: input, shape index: {}]   ;;  %s1070_s0 = inlined_call_operand.vmem [shape: bf16[128,256], index: 0, kind: input, shape index: {}]   ;;  %s1071_s4 = inlined_call_operand.vmem [shape: bf16[64,1], index: 4, kind: input, shape index: {}]   ;;  %s1072_s5 = inlined_call_operand.<no memory space> [shape: f32[1,1], index: 5, kind: input, shape index: {}]   ;;  %s1073_s2 = inlined_call_operand.vmem [shape: f32[1,64], index: 2, kind: input, shape index: {}]   ;;  %s1074_s3 = inlined_call_operand.vmem [shape: f32[1,64], index: 3, kind: input, shape index: {}]   ;;  %s1075_s6 = inlined_call_operand.vmem [shape: f32[128,1], index: 6, kind: output, shape index: {}]  }
   0x1   :  { %v762_v0 = vld [vmem:[%s1069_s1 + $0x40] sm:$0xff]   ;;  %v764_v2 = vld [vmem:[%s1069_s1 + $0x48] sm:$0xff]   ;;  %v766_v4 = vld [vmem:[%s1069_s1 + $0x50] sm:$0xff]   ;;  %v11_v36 = vstv %s1072_s5 }
   0x2   :  { %v763_v1 = vld [vmem:[%s1069_s1] sm:$0xff]   ;;  %646 = vmatprep.subr.bf16.mxu0 %v762_v0  ;;  %746 = vmatprep.subr.bf16.mxu1 %v762_v0  ;;  %v765_v3 = vld [vmem:[%s1069_s1 + $0x8] sm:$0xff]   ;;  %v767_v5 = vld [vmem:[%s1069_s1 + $0x10] sm:$0xff]   ;;  %12 = vst [vmem:[#allocation2] sm:$0x1] %v11_v36 }
   0x3   :  { %647 = vmatpush3.bf16.msra.mxu0 %v763_v1  ;;  %754 = vmatpush3.bf16.msra.mxu1 %v763_v1  ;;  %v768_v6 = vld [vmem:[%s1069_s1 + $0x58] sm:$0xff]   ;;  %v770_v8 = vld [vmem:[%s1069_s1 + $0x60] sm:$0xff]   ;;  %v772_v10 = vld [vmem:[%s1069_s1 + $0x68] sm:$0xff]  }
   0x4   :  { %648 = vmatprep.subr.bf16.mxu0 %v764_v2  ;;  %747 = vmatprep.subr.bf16.mxu1 %v764_v2  ;;  %v769_v7 = vld [vmem:[%s1069_s1 + $0x18] sm:$0xff]   ;;  %v771_v9 = vld [vmem:[%s1069_s1 + $0x20] sm:$0xff]   ;;  %v773_v12 = vld [vmem:[%s1069_s1 + $0x28] sm:$0xff]  }
   0x5   :  { %v780_v11 = vld [vmem:[%s1070_s0 + $0x4] ss:$8 sps:$4 sm:$0xff]   ;;  %v774_v13 = vld [vmem:[%s1069_s1 + $0x70] sm:$0xff]   ;;  %v776_v16 = vld [vmem:[%s1069_s1 + $0x78] sm:$0xff]  }
   0x6   :  { %282 = vmatprep.mubr.bf16.mxu0 %v780_v11  ;;  %v775_v14 = vld [vmem:[%s1069_s1 + $0x30] sm:$0xff]   ;;  %v795_v15 = vld [vmem:[%s1070_s0 + $0x64] ss:$8 sps:$4 sm:$0xff]   ;;  %v777_v17 = vld [vmem:[%s1069_s1 + $0x38] sm:$0xff]  }
   0x7   :  { %649 = vmatpush3.bf16.msra.mxu0 %v765_v3  ;;  %755 = vmatpush3.bf16.msra.mxu1 %v765_v3  ;;  %v778_v18 = vld [vmem:[%s1070_s0] ss:$8 sps:$4 sm:$0xff]   ;;  %v781_v19 = vld [vmem:[%s1070_s0 + $0x14] ss:$8 sps:$4 sm:$0xff]   ;;  %v783_v22 = vld [vmem:[%s1070_s0 + $0x10] ss:$8 sps:$4 sm:$0xff]  }
   0x8   :  { %650 = vmatprep.subr.bf16.mxu0 %v766_v4  ;;  %748 = vmatprep.subr.bf16.mxu1 %v766_v4  ;;  %v793_v20 = vld [vmem:[%s1070_s0 + $0x60] ss:$8 sps:$4 sm:$0xff]   ;;  %v799_v21 = vld [vmem:[%s1070_s0 + $0x74] ss:$8 sps:$4 sm:$0xff]   ;;  %v784_v23 = vld [vmem:[%s1070_s0 + $0x24] ss:$8 sps:$4 sm:$0xff]  }
   0x9   :  { %330 = vmatprep.mubr.bf16.mxu1 %v795_v15  ;;  %v801_v24 = vld [vmem:[%s1070_s0 + $0x70] ss:$8 sps:$4 sm:$0xff]   ;;  %v786_v25 = vld [vmem:[%s1070_s0 + $0x20] ss:$8 sps:$4 sm:$0xff]   ;;  %v787_v26 = vld [vmem:[%s1070_s0 + $0x34] ss:$8 sps:$4 sm:$0xff]  }
   0xa   :  { %v789_v27 = vld [vmem:[%s1070_s0 + $0x30] ss:$8 sps:$4 sm:$0xff]   ;;  %v790_v28 = vld [vmem:[%s1070_s0 + $0x44] ss:$8 sps:$4 sm:$0xff]   ;;  %v792_v29 = vld [vmem:[%s1070_s0 + $0x40] ss:$8 sps:$4 sm:$0xff]  }
   0xb   :  { %651 = vmatpush3.bf16.msra.mxu0 %v767_v5  ;;  %756 = vmatpush3.bf16.msra.mxu1 %v767_v5  ;;  %v796_v30 = vld [vmem:[%s1070_s0 + $0x54] ss:$8 sps:$4 sm:$0xff]   ;;  %v798_v31 = vld [vmem:[%s1070_s0 + $0x50] ss:$8 sps:$4 sm:$0xff]   ;;  %v802_v32 = vld [vmem:[%s1071_s4] sm:$0xff]  }
   0xc   :  { %652 = vmatprep.subr.bf16.mxu0 %v768_v6  ;;  %749 = vmatprep.subr.bf16.mxu1 %v768_v6  ;;  %v803_v33 = vld [vmem:[%s1071_s4 + $0x8] sm:$0xff]   ;;  %v804_v34 = vld [vmem:[%s1071_s4 + $0x10] sm:$0xff]   ;;  %v805_v35 = vld [vmem:[%s1071_s4 + $0x18] sm:$0xff]  }
   0xd   :  { %v955_v39 = vld [vmem:[%s1073_s2] ss:$0 sm:$0xff] }
   0xe   :  { %v960_v44 = vld [vmem:[%s1074_s3] ss:$0 sm:$0xff] }
   0xf   :  { %653 = vmatpush3.bf16.msra.mxu0 %v769_v7  ;;  %757 = vmatpush3.bf16.msra.mxu1 %v769_v7 }
  0x10   :  { %654 = vmatprep.subr.bf16.mxu0 %v770_v8  ;;  %750 = vmatprep.subr.bf16.mxu1 %v770_v8 }
  0x13   :  { %655 = vmatpush3.bf16.msra.mxu0 %v771_v9  ;;  %758 = vmatpush3.bf16.msra.mxu1 %v771_v9 }
  0x14   :  { %656 = vmatprep.subr.bf16.mxu0 %v772_v10  ;;  %751 = vmatprep.subr.bf16.mxu1 %v772_v10 }
  0x17   :  { %657 = vmatpush3.bf16.msra.mxu0 %v773_v12  ;;  %759 = vmatpush3.bf16.msra.mxu1 %v773_v12 }
  0x18   :  { %658 = vmatprep.subr.bf16.mxu0 %v774_v13  ;;  %752 = vmatprep.subr.bf16.mxu1 %v774_v13 }
  0x1b   :  { %659 = vmatpush3.bf16.msra.mxu0 %v775_v14  ;;  %760 = vmatpush3.bf16.msra.mxu1 %v775_v14 }
  0x1c   :  { %660 = vmatprep.subr.bf16.mxu0 %v776_v16  ;;  %753 = vmatprep.subr.bf16.mxu1 %v776_v16 }
  0x1f   :  { %661 = vmatpush3.bf16.msra.mxu0 %v777_v17  ;;  %761 = vmatpush3.bf16.msra.mxu1 %v777_v17 }
  0x20   :  { %722 = vmatprep.subr.bf16.mxu1 %v802_v32 }
  0x22   :  { %283 = vmatmul.mubr.bf16.vlgmr.msra.gmra.mrb[0].mxu0 %v778_v18  ;;  %331 = vmatmul.mubr.bf16.vlgmr.msra.gmra.mrb[0].mxu1 %v793_v20 }
  0x23   :  { %290 = vmatprep.mubr.bf16.mxu0 %v781_v19  ;;  %338 = vmatprep.mubr.bf16.mxu1 %v799_v21 }
  0x24   :  { %723 = vmatpush3.bf16.msra.mxu1 %v802_v32 }
  0x25   :  { %724 = vmatprep.subr.bf16.mxu1 %v803_v33 }
  0x28   :  { %725 = vmatpush3.bf16.msra.mxu1 %v803_v33 }
  0x29   :  { %726 = vmatprep.subr.bf16.mxu1 %v804_v34 }
  0x2a   :  { %291 = vmatmul.mubr.bf16.gmra.mrb[4].mxu0 %v783_v22  ;;  %339 = vmatmul.mubr.bf16.gmra.mrb[4].mxu1 %v801_v24 }
  0x2b   :  { %298 = vmatprep.mubr.bf16.mxu0 %v784_v23 }
  0x2c   :  { %727 = vmatpush3.bf16.msra.mxu1 %v804_v34 }
  0x2d   :  { %728 = vmatprep.subr.bf16.mxu1 %v805_v35 }
  0x30   :  { %729 = vmatpush3.bf16.msra.mxu1 %v805_v35 }
  0x32   :  { %299 = vmatmul.mubr.bf16.gmra.mrb[8].mxu0 %v786_v25 }
  0x33   :  { %306 = vmatprep.mubr.bf16.mxu0 %v787_v26 }
  0x3a   :  { %307 = vmatmul.mubr.bf16.gmra.mrb[12].mxu0 %v789_v27 }
  0x3b   :  { %314 = vmatprep.mubr.bf16.mxu0 %v790_v28 }
  0x42   :  { %315 = vmatmul.mubr.bf16.gmra.mrb[16].mxu0 %v792_v29 }
  0x43   :  { %322 = vmatprep.mubr.bf16.mxu0 %v796_v30 }
  0x4a   :  { %323 = vmatmul.mubr.bf16.gmra.mrb[20].mxu0 %v798_v31 }
  0xf5   :  { %v662_v37 = vpop.f32.mrb[0].mxu0  ;;  %v698_v40 = vpop.f32.mrb[0].mxu1 }
  0xf6   :  { %v663_v38 = vpop.f32.mrb[1].mxu0  ;;  %v699_v43 = vpop.f32.mrb[1].mxu1 }
  0xf7   :  { %v664_v41 = vadd.f32 %v663_v38, %v662_v37  ;;  %v665_v42 = vpop.f32.mrb[2].mxu0  ;;  %v700_v46 = vadd.f32 %v699_v43, %v698_v40  ;;  %v701_v47 = vpop.f32.mrb[2].mxu1 }
  0xf8   :  { %v666_v45 = vpop.f32.mrb[3].mxu0  ;;  %v702_v50 = vpop.f32.mrb[3].mxu1 }
  0xf9   :  { %v354_v48 = vmul.f32 %v664_v41, %v955_v39  ;;  %v667_v49 = vadd.f32 %v666_v45, %v665_v42  ;;  %v366_v51 = vmul.f32 %v700_v46, %v955_v39  ;;  %v703_v52 = vadd.f32 %v702_v50, %v701_v47 }
  0xfb   :  { %v377_v53 = vadd.f32 %v960_v44, %v354_v48  ;;  %v355_v54 = vmul.f32 %v667_v49, %v955_v39  ;;  %v389_v55 = vadd.f32 %v960_v44, %v366_v51  ;;  %v367_v56 = vmul.f32 %v703_v52, %v955_v39 }
  0xfd   :  { %v378_v57 = vadd.f32 %v960_v44, %v355_v54  ;;  %v668_v58 = vpop.f32.mrb[4].mxu0  ;;  %v405_v60 = vmax.f32 %v389_v55, 0.0  ;;  %v390_v61 = vadd.f32 %v960_v44, %v367_v56  ;;  %v704_v62 = vpop.f32.mrb[4].mxu1  ;;  %v393_v63 = vmax.f32 %v377_v53, 0.0 }
  0xfe   :  { %v669_v59 = vpop.f32.mrb[5].mxu0  ;;  %v705_v3 = vpop.f32.mrb[5].mxu1 }
  0xff   :  { %v394_v0 = vmax.f32 %v378_v57, 0.0  ;;  %v670_v1 = vadd.f32 %v669_v59, %v668_v58  ;;  %v671_v2 = vpop.f32.mrb[6].mxu0  ;;  %v406_v5 = vmax.f32 %v390_v61, 0.0  ;;  %v706_v6 = vadd.f32 %v705_v3, %v704_v62  ;;  %v707_v7 = vpop.f32.mrb[6].mxu1 }
 0x100   :  { %v672_v4 = vpop.f32.mrb[7].mxu0  ;;  %v708_v11 = vpop.f32.mrb[7].mxu1 }
 0x101   :  { %v409_v8 = vpack.c.bf16 %v394_v0, %v393_v63  ;;  %v356_v9 = vmul.f32 %v670_v1, %v955_v39  ;;  %v673_v10 = vadd.f32 %v672_v4, %v671_v2  ;;  %v971_v12 = vpack.c.bf16 %v406_v5, %v405_v60 }
 0x102   :  { %v368_v13 = vmul.f32 %v706_v6, %v955_v39  ;;  %v709_v14 = vadd.f32 %v708_v11, %v707_v7 }
 0x103   :  { %v379_v15 = vadd.f32 %v960_v44, %v356_v9  ;;  %v357_v16 = vmul.f32 %v673_v10, %v955_v39  ;;  %730 = vmatprep.mubr.msk.bf16.mxu1 %vm456_vm0, %v409_v8 }
 0x104   :  { %v391_v17 = vadd.f32 %v960_v44, %v368_v13  ;;  %v369_v18 = vmul.f32 %v709_v14, %v955_v39 }
 0x105   :  { %v380_v19 = vadd.f32 %v960_v44, %v357_v16  ;;  %v674_v20 = vpop.f32.mrb[8].mxu0  ;;  %v395_v24 = vmax.f32 %v379_v15, 0.0 }
 0x106   :  { %v675_v21 = vpop.f32.mrb[9].mxu0  ;;  %v407_v22 = vmax.f32 %v391_v17, 0.0  ;;  %v392_v23 = vadd.f32 %v960_v44, %v369_v18  ;;  %v633_v18 = vld [vmem:[#allocation2] ss:$0 sm:$0xff] }
 0x107   :  { %v396_v25 = vmax.f32 %v380_v19, 0.0  ;;  %v676_v26 = vadd.f32 %v675_v21, %v674_v20  ;;  %v677_v27 = vpop.f32.mrb[10].mxu0 }
 0x108   :  { %v678_v28 = vpop.f32.mrb[11].mxu0  ;;  %v408_v29 = vmax.f32 %v392_v23, 0.0 }
 0x109   :  { %v410_v30 = vpack.c.bf16 %v396_v25, %v395_v24  ;;  %v358_v31 = vmul.f32 %v676_v26, %v955_v39  ;;  %v679_v32 = vadd.f32 %v678_v28, %v677_v27 }
 0x10a   :  { %v416_v33 = vpack.c.bf16 %v408_v29, %v407_v22 }
 0x10b   :  { %v381_v34 = vadd.f32 %v960_v44, %v358_v31  ;;  %v359_v35 = vmul.f32 %v679_v32, %v955_v39  ;;  %731 = vmatmul.mubr.msk.bf16.vlgmr.msra.gmra.mrb[8].mxu1 %vm456_vm0, %v410_v30 }
 0x10d   :  { %v382_v36 = vadd.f32 %v960_v44, %v359_v35  ;;  %v680_v37 = vpop.f32.mrb[12].mxu0  ;;  %v397_v40 = vmax.f32 %v381_v34, 0.0 }
 0x10e   :  { %v681_v38 = vpop.f32.mrb[13].mxu0 }
 0x10f   :  { %v398_v41 = vmax.f32 %v382_v36, 0.0  ;;  %v682_v42 = vadd.f32 %v681_v38, %v680_v37  ;;  %v683_v43 = vpop.f32.mrb[14].mxu0 }
 0x110   :  { %v684_v45 = vpop.f32.mrb[15].mxu0 }
 0x111   :  { %v411_v46 = vpack.c.bf16 %v398_v41, %v397_v40  ;;  %v360_v47 = vmul.f32 %v682_v42, %v955_v39  ;;  %v685_v48 = vadd.f32 %v684_v45, %v683_v43 }
 0x113   :  { %v383_v49 = vadd.f32 %v960_v44, %v360_v47  ;;  %v361_v50 = vmul.f32 %v685_v48, %v955_v39  ;;  %734 = vmatprep.mubr.msk.bf16.mxu1 %vm456_vm0, %v411_v46 }
 0x115   :  { %v384_v51 = vadd.f32 %v960_v44, %v361_v50  ;;  %v686_v52 = vpop.f32.mrb[16].mxu0  ;;  %v399_v54 = vmax.f32 %v383_v49, 0.0 }
 0x116   :  { %v687_v53 = vpop.f32.mrb[17].mxu0 }
 0x117   :  { %v400_v55 = vmax.f32 %v384_v51, 0.0  ;;  %v688_v56 = vadd.f32 %v687_v53, %v686_v52  ;;  %v689_v57 = vpop.f32.mrb[18].mxu0 }
 0x118   :  { %v690_v58 = vpop.f32.mrb[19].mxu0 }
 0x119   :  { %v412_v59 = vpack.c.bf16 %v400_v55, %v399_v54  ;;  %v362_v60 = vmul.f32 %v688_v56, %v955_v39  ;;  %v691_v61 = vadd.f32 %v690_v58, %v689_v57 }
 0x11b   :  { %v385_v62 = vadd.f32 %v960_v44, %v362_v60  ;;  %v363_v63 = vmul.f32 %v691_v61, %v955_v39  ;;  %735 = vmatmul.mubr.msk.bf16.gmra.mrb[12].mxu1 %vm456_vm0, %v412_v59 }
 0x11d   :  { %v386_v0 = vadd.f32 %v960_v44, %v363_v63  ;;  %v692_v1 = vpop.f32.mrb[20].mxu0  ;;  %v401_v3 = vmax.f32 %v385_v62, 0.0 }
 0x11e   :  { %v693_v2 = vpop.f32.mrb[21].mxu0 }
 0x11f   :  { %v402_v4 = vmax.f32 %v386_v0, 0.0  ;;  %v694_v5 = vadd.f32 %v693_v2, %v692_v1  ;;  %v695_v6 = vpop.f32.mrb[22].mxu0 }
 0x120   :  { %v696_v7 = vpop.f32.mrb[23].mxu0 }
 0x121   :  { %v413_v8 = vpack.c.bf16 %v402_v4, %v401_v3  ;;  %v364_v9 = vmul.f32 %v694_v5, %v955_v39  ;;  %v697_v10 = vadd.f32 %v696_v7, %v695_v6 }
 0x123   :  { %v387_v11 = vadd.f32 %v960_v44, %v364_v9  ;;  %v365_v13 = vmul.f32 %v697_v10, %v955_v39  ;;  %738 = vmatprep.mubr.msk.bf16.mxu1 %vm456_vm0, %v413_v8 }
 0x125   :  { %v388_v14 = vadd.f32 %v960_v44, %v365_v13  ;;  %v403_v15 = vmax.f32 %v387_v11, 0.0 }
 0x127   :  { %v404_v16 = vmax.f32 %v388_v14, 0.0 }
 0x129   :  { %v414_v17 = vpack.c.bf16 %v404_v16, %v403_v15 }
 0x12b   :  { %739 = vmatmul.mubr.msk.bf16.gmra.mrb[16].mxu1 %vm456_vm0, %v414_v17 }
 0x12c   :  { %742 = vmatprep.mubr.msk.bf16.mxu1 %vm456_vm0, %v971_v12 }
 0x133   :  { %743 = vmatmul.mubr.msk.bf16.gmra.mrb[20].mxu1 %vm456_vm0, %v416_v33 }
 0x1de   :  { %v732_v19 = vpop.f32.mrb[8].mxu1 }
 0x1df   :  { %v524_v20 = vadd.f32 %v732_v19, %v633_v18  ;;  %v515_v21 = vpop.f32.mrb[9].mxu1 }
 0x1e0   :  { %v516_v39 = vadd.f32 %v633_v18, %v515_v21  ;;  %v733_v22 = vpop.f32.mrb[10].mxu1 }
 0x1e1   :  { %581 = vst.msk [vmem:[%s1075_s6 + $0x10] sm:$0xff] %vm578_vm1, %v524_v20  ;;  %v527_v44 = vadd.f32 %v733_v22, %v633_v18  ;;  %v518_v23 = vpop.f32.mrb[11].mxu1 }
 0x1e2   :  { %579 = vst.msk [vmem:[%s1075_s6] sm:$0xff] %vm578_vm1, %v516_v39  ;;  %v519_v12 = vadd.f32 %v633_v18, %v518_v23 }
 0x1e3   :  { %582 = vst.msk [vmem:[%s1075_s6 + $0x18] sm:$0xff] %vm578_vm1, %v527_v44 }
 0x1e4   :  { %580 = vst.msk [vmem:[%s1075_s6 + $0x8] sm:$0xff] %vm578_vm1, %v519_v12 }
 0x1ee   :  { %v736_v24 = vpop.f32.mrb[12].mxu1 }
 0x1ef   :  { %v540_v25 = vadd.f32 %v736_v24, %v633_v18  ;;  %v531_v26 = vpop.f32.mrb[13].mxu1 }
 0x1f0   :  { %v532_v27 = vadd.f32 %v633_v18, %v531_v26  ;;  %v737_v28 = vpop.f32.mrb[14].mxu1 }
 0x1f1   :  { %585 = vst.msk [vmem:[%s1075_s6 + $0x30] sm:$0xff] %vm578_vm1, %v540_v25  ;;  %v543_v29 = vadd.f32 %v737_v28, %v633_v18  ;;  %v534_v30 = vpop.f32.mrb[15].mxu1 }
 0x1f2   :  { %583 = vst.msk [vmem:[%s1075_s6 + $0x20] sm:$0xff] %vm578_vm1, %v532_v27  ;;  %v535_v31 = vadd.f32 %v633_v18, %v534_v30 }
 0x1f3   :  { %586 = vst.msk [vmem:[%s1075_s6 + $0x38] sm:$0xff] %vm578_vm1, %v543_v29 }
 0x1f4   :  { %584 = vst.msk [vmem:[%s1075_s6 + $0x28] sm:$0xff] %vm578_vm1, %v535_v31 }
 0x1fe   :  { %v740_v32 = vpop.f32.mrb[16].mxu1 }
 0x1ff   :  { %v556_v33 = vadd.f32 %v740_v32, %v633_v18  ;;  %v547_v34 = vpop.f32.mrb[17].mxu1 }
 0x200   :  { %v548_v35 = vadd.f32 %v633_v18, %v547_v34  ;;  %v741_v36 = vpop.f32.mrb[18].mxu1 }
 0x201   :  { %589 = vst.msk [vmem:[%s1075_s6 + $0x50] sm:$0xff] %vm578_vm1, %v556_v33  ;;  %v559_v37 = vadd.f32 %v741_v36, %v633_v18  ;;  %v550_v38 = vpop.f32.mrb[19].mxu1 }
 0x202   :  { %587 = vst.msk [vmem:[%s1075_s6 + $0x40] sm:$0xff] %vm578_vm1, %v548_v35  ;;  %v551_v40 = vadd.f32 %v633_v18, %v550_v38 }
 0x203   :  { %590 = vst.msk [vmem:[%s1075_s6 + $0x58] sm:$0xff] %vm578_vm1, %v559_v37 }
 0x204   :  { %588 = vst.msk [vmem:[%s1075_s6 + $0x48] sm:$0xff] %vm578_vm1, %v551_v40 }
 0x206   :  { %v744_v41 = vpop.f32.mrb[20].mxu1 }
 0x207   :  { %v572_v42 = vadd.f32 %v744_v41, %v633_v18  ;;  %v563_v43 = vpop.f32.mrb[21].mxu1 }
 0x208   :  { %v564_v45 = vadd.f32 %v633_v18, %v563_v43  ;;  %v745_v46 = vpop.f32.mrb[22].mxu1 }
 0x209   :  { %593 = vst.msk [vmem:[%s1075_s6 + $0x70] sm:$0xff] %vm578_vm1, %v572_v42  ;;  %v575_v47 = vadd.f32 %v745_v46, %v633_v18  ;;  %v566_v48 = vpop.f32.mrb[23].mxu1 }
 0x20a   :  { %591 = vst.msk [vmem:[%s1075_s6 + $0x60] sm:$0xff] %vm578_vm1, %v564_v45  ;;  %v567_v49 = vadd.f32 %v633_v18, %v566_v48 }
 0x20b   :  { %594 = vst.msk [vmem:[%s1075_s6 + $0x78] sm:$0xff] %vm578_vm1, %v575_v47 }
 0x20c   :  { %592 = vst.msk [vmem:[%s1075_s6 + $0x68] sm:$0xff] %vm578_vm1, %v567_v49 }

</bundles_post_ra>
